<compile_context>
chip_gen: v6e
topology: v6e:2x2x1
jax: 0.10.0
libtpu: 0.0.40
codegen_flags: <defaults>
</compile_context>

<pallas_src>
import jax
import jax.numpy as jnp
from jax import lax
from jax.experimental import pallas as pl
from jax.experimental.pallas import tpu as pltpu

EPS = 1e-5


def _sain_kernel(wb_ref, bboxn_ref, x_ref, o_ref):
    # Block shapes per grid step:
    #   wb_ref:    (1, 2*TC, O)  [weight rows ; bias rows] for this C tile
    #   bboxn_ref: (1, O, HW)    mask-normalized bbox, resident across C tiles
    #   x_ref:     (1, TC, HW)
    #   o_ref:     (1, TC, HW)
    tc = x_ref.shape[1]
    inv_hw = 1.0 / x_ref.shape[2]

    # One fused (2*TC, O) @ (O, HW) MXU matmul for both modulation maps.
    mod = jnp.dot(wb_ref[0], bboxn_ref[0], preferred_element_type=jnp.float32)
    wmap = mod[:tc]                               # (TC, HW)
    bmap = mod[tc:]                               # (TC, HW)

    # Single-pass instance-norm statistics (biased variance), fully fused with
    # the spatial affine:  out = x*scale + (bmap - mean*scale),
    # scale = (wmap + 1) * rsqrt(var + eps).  The centered x is never built.
    x = x_ref[0].astype(jnp.float32)              # (TC, HW)
    s1 = jnp.sum(x, axis=1, keepdims=True)        # (TC, 1)
    s2 = jnp.sum(x * x, axis=1, keepdims=True)    # (TC, 1)
    mean = s1 * inv_hw
    var = jnp.maximum(s2 * inv_hw - mean * mean, 0.0)
    rs = lax.rsqrt(var + EPS)                     # (TC, 1)
    scale = wmap * rs + rs                        # == (wmap + 1) * rs
    shift = bmap - mean * scale
    o_ref[0] = (x * scale + shift).astype(o_ref.dtype)


def _vmem_limit_bytes():
    """Explicit scoped-VMEM limit: ~0.75 of physical, capped at 100 MiB.

    v5e/v6e (128 MiB physical) -> 96 MiB; v7x (64 MiB per TC) -> 48 MiB.
    Falls back to a v7x-safe 48 MiB if the hardware query is unavailable.
    """
    try:
        cap = pltpu.get_tpu_info().vmem_capacity_bytes
    except Exception:
        cap = 64 * 1024 * 1024
    return int(min((cap * 3) // 4, 100 * 1024 * 1024))


def _pick_c_tile(c, hw, o, x_itemsize, mod_itemsize, vmem_budget):
    """Channel tile sized from a whole-pipeline VMEM budget, dtype-aware."""
    align = {4: 8, 2: 16, 1: 32}.get(x_itemsize, 8)
    # Resident (double-buffered) normalized bbox block.
    fixed = 2 * o * hw * mod_itemsize
    # Per channel row: double-buffered x-in + out, plus 2 projection rows.
    per_row = 2 * hw * x_itemsize + 2 * hw * x_itemsize + 2 * 2 * o * mod_itemsize
    avail = max(vmem_budget - fixed, per_row * align)
    c_max = max(align, int(avail // per_row))
    if c <= c_max:
        return c                                   # single / full-dim tile
    # Prefer an aligned divisor of C (no partial final block, no masking).
    top = (c_max // align) * align
    for cand in range(top, 0, -align):
        if c % cand == 0:
            return cand
    # Fall back to a cdiv grid with a masked partial final block.
    return top


def spatial_adaptive_instance_norm(x, w, bbox, wproj_w, wproj_b, bproj_w,
                                   bproj_b, *, c_tile=None):
    """x: (B,C,H,W), w: (B,O,NW), bbox: (B,O,H,W). Params in PyTorch Linear
    convention: wproj_w/bproj_w: (C, NW), wproj_b/bproj_b: (C,)."""
    b, c, H, W = x.shape
    _, o, _, _ = bbox.shape
    hw = H * W
    out_dtype = x.dtype
    f32 = jnp.float32
    # bf16 inputs keep their modulation path in bf16 (MXU-native, half the HBM
    # and VMEM); f32 inputs stay fully f32 for reference-level accuracy.
    mod_dtype = jnp.bfloat16 if x.dtype == jnp.bfloat16 else jnp.float32

    # Tiny style projections hoisted to plain JAX, directly in (B, C, O) layout.
    weight_co = (jnp.einsum('bon,cn->bco', w.astype(f32), wproj_w.astype(f32))
                 + wproj_b.astype(f32)[None, :, None])             # (B, C, O)
    bias_co = (jnp.einsum('bon,cn->bco', w.astype(f32), bproj_w.astype(f32))
               + bproj_b.astype(f32)[None, :, None])               # (B, C, O)

    # Mask-normalized bbox precomputed once in plain JAX (removes the in-kernel
    # scratch carry -> both grid axes can be "parallel").
    bbox2 = bbox.reshape(b, o, hw).astype(f32)
    denom = jnp.sum(bbox2, axis=1, keepdims=True) + 1e-6           # (B, 1, HW)
    bboxn = (bbox2 / denom).astype(mod_dtype)                      # (B, O, HW)

    x_itemsize = jnp.dtype(x.dtype).itemsize
    mod_itemsize = jnp.dtype(mod_dtype).itemsize
    vmem_limit = _vmem_limit_bytes()
    if c_tile is None:
        c_tile = _pick_c_tile(c, hw, o, x_itemsize, mod_itemsize,
                              (vmem_limit * 3) // 4)
    c_tile = max(1, min(c_tile, c))
    nt = pl.cdiv(c, c_tile)

    # Pre-tile the projections as [weight rows ; bias rows] per C tile so the
    # kernel issues ONE (2*TC, O) @ (O, HW) matmul. Only this tiny (B, C, O)
    # tensor is padded — the (B, C, HW) activations are never padded or sliced.
    c_pad = nt * c_tile - c
    if c_pad:
        weight_co = jnp.pad(weight_co, ((0, 0), (0, c_pad), (0, 0)))
        bias_co = jnp.pad(bias_co, ((0, 0), (0, c_pad), (0, 0)))
    wb = jnp.stack(
        [weight_co.reshape(b, nt, c_tile, o).astype(mod_dtype),
         bias_co.reshape(b, nt, c_tile, o).astype(mod_dtype)],
        axis=2).reshape(b, nt * 2 * c_tile, o)                     # (B, nt*2*TC, O)

    x2 = x.reshape(b, c, hw)

    cost = pl.CostEstimate(
        flops=4 * b * c * o * hw + 10 * b * c * hw,
        transcendentals=b * c,
        bytes_accessed=(2 * x2.size * x_itemsize
                        + bboxn.size * mod_itemsize
                        + wb.size * mod_itemsize),
    )

    out = pl.pallas_call(
        _sain_kernel,
        out_shape=jax.ShapeDtypeStruct((b, c, hw), out_dtype),
        grid_spec=pltpu.PrefetchScalarGridSpec(
            num_scalar_prefetch=0,
            grid=(b, nt),
            in_specs=[
                # Per-tile [weight ; bias] slab.
                pl.BlockSpec((1, 2 * c_tile, o), lambda i, j: (i, j, 0)),
                # Normalized bbox ignores the inner C axis -> stays resident.
                pl.BlockSpec((1, o, hw), lambda i, j: (i, 0, 0)),
                pl.BlockSpec((1, c_tile, hw), lambda i, j: (i, j, 0)),
            ],
            out_specs=pl.BlockSpec((1, c_tile, hw), lambda i, j: (i, j, 0)),
        ),
        # No inner-axis carry anymore -> both axes parallel (megacore/v7x).
        compiler_params=pltpu.CompilerParams(
            dimension_semantics=("parallel", "parallel"),
            vmem_limit_bytes=vmem_limit),
        cost_estimate=cost,
    )(wb, bboxn, x2)

    return out.reshape(b, c, H, W)


def reference(x, w, bbox, wproj_w, wproj_b, bproj_w, bproj_b):
    """Pure-JAX reference mirroring the PyTorch forward semantics."""
    weight = jnp.einsum('bon,cn->boc', w, wproj_w) + wproj_b       # (B,O,C)
    bias = jnp.einsum('bon,cn->boc', w, bproj_w) + bproj_b         # (B,O,C)
    denom = jnp.sum(bbox, axis=1, keepdims=True) + 1e-6            # (B,1,H,W)
    wmap = jnp.einsum('bohw,boc->bchw', bbox, weight) / denom + 1.0
    bmap = jnp.einsum('bohw,boc->bchw', bbox, bias) / denom
    mean = jnp.mean(x, axis=(2, 3), keepdims=True)
    var = jnp.mean(jnp.square(x - mean), axis=(2, 3), keepdims=True)
    xn = (x - mean) / jnp.sqrt(var + EPS)
    return xn * wmap + bmap


def _run_case(B, C, O, H, W, NW, case, c_tile=None):
    key = jax.random.fold_in(jax.random.PRNGKey(0), case)
    k_x, k_w, k_bbox, k_ww, k_wb, k_bw, k_bb = jax.random.split(key, 7)

    x = jax.random.normal(k_x, (B, C, H, W), dtype=jnp.float32)
    wvec = jax.random.normal(k_w, (B, O, NW), dtype=jnp.float32)
    bbox = (jax.random.uniform(k_bbox, (B, O, H, W), dtype=jnp.float32) > 0.5
            ).astype(jnp.float32)

    bound = 1.0 / (NW ** 0.5)
    wproj_w = jax.random.uniform(k_ww, (C, NW), minval=-bound, maxval=bound)
    wproj_b = jax.random.uniform(k_wb, (C,), minval=-bound, maxval=bound)
    bproj_w = jax.random.uniform(k_bw, (C, NW), minval=-bound, maxval=bound)
    bproj_b = jax.random.uniform(k_bb, (C,), minval=-bound, maxval=bound)

    out = spatial_adaptive_instance_norm(x, wvec, bbox, wproj_w, wproj_b,
                                         bproj_w, bproj_b, c_tile=c_tile)
    out = jax.block_until_ready(out)

    ref = reference(x, wvec, bbox, wproj_w, wproj_b, bproj_w, bproj_b)
    assert out.shape == (B, C, H, W)
    assert jnp.allclose(out, ref, rtol=1e-4, atol=1e-4), (
        float(jnp.max(jnp.abs(out - ref))))


if __name__ == "__main__":
    # Small shape consistent with the module (single full-channel tile).
    _run_case(B=2, C=4, O=8, H=16, W=16, NW=32, case=0)
    # Forced c_tile=8 with C=12: exercises multi-C-tile + masked partial final
    # block (no activation padding/slicing) with both grid axes parallel.
    _run_case(B=2, C=12, O=8, H=16, W=16, NW=32, case=1, c_tile=8)
    print("KERNEL_OK")
</pallas_src>

<mosaic_0001>
module attributes {stable_mosaic.version = 11 : i64} {
  func.func @_sain_kernel(%arg0: i32, %arg1: i32, %arg2: memref<1x8x8xf32, #tpu.memory_space<vmem>>, %arg3: memref<1x8x256xf32, #tpu.memory_space<vmem>>, %arg4: memref<1x4x256xf32, #tpu.memory_space<vmem>>, %arg5: memref<1x4x256xf32, #tpu.memory_space<vmem>>) attributes {dimension_semantics = [#tpu.dimension_semantics<parallel>, #tpu.dimension_semantics<parallel>], iteration_bounds = array<i64: 2, 1>, scalar_prefetch = 0 : i64, scratch_operands = 0 : i64, tpu.core_type = #tpu.core_type<tc>, window_params = [{transform_indices = @transform_0, window_bounds = array<i64: 1, 8, 8>}, {transform_indices = @transform_1, window_bounds = array<i64: 1, 8, 256>}, {transform_indices = @transform_2, window_bounds = array<i64: 1, 4, 256>}, {transform_indices = @transform_3, window_bounds = array<i64: 1, 4, 256>}]} {
    %c0 = arith.constant 0 : index
    %c0_0 = arith.constant 0 : index
    %c0_1 = arith.constant 0 : index
    %0 = vector.load %arg2[%c0, %c0_0, %c0_1] : memref<1x8x8xf32, #tpu.memory_space<vmem>>, vector<1x8x8xf32>
    %1 = vector.shape_cast %0 : vector<1x8x8xf32> to vector<8x8xf32>
    %c0_2 = arith.constant 0 : index
    %c0_3 = arith.constant 0 : index
    %c0_4 = arith.constant 0 : index
    %2 = vector.load %arg3[%c0_2, %c0_3, %c0_4] : memref<1x8x256xf32, #tpu.memory_space<vmem>>, vector<1x8x256xf32>
    %3 = vector.shape_cast %2 : vector<1x8x256xf32> to vector<8x256xf32>
    %cst = arith.constant dense<0.000000e+00> : vector<8x256xf32>
    %4 = tpu.matmul %1, %3, %cst {dimension_numbers = #tpu.dot_dimension_numbers<[1], [0], [0], [1], [0, 0, 1, 1], [], []>} : vector<8x8xf32>, vector<8x256xf32>, vector<8x256xf32> -> vector<8x256xf32>
    %5 = vector.extract_strided_slice %4 {offsets = [0, 0], sizes = [4, 256], strides = [1, 1]} : vector<8x256xf32> to vector<4x256xf32>
    %6 = vector.extract_strided_slice %4 {offsets = [4, 0], sizes = [4, 256], strides = [1, 1]} : vector<8x256xf32> to vector<4x256xf32>
    %c0_5 = arith.constant 0 : index
    %c0_6 = arith.constant 0 : index
    %c0_7 = arith.constant 0 : index
    %7 = vector.load %arg4[%c0_5, %c0_6, %c0_7] : memref<1x4x256xf32, #tpu.memory_space<vmem>>, vector<1x4x256xf32>
    %8 = vector.shape_cast %7 : vector<1x4x256xf32> to vector<4x256xf32>
    %cst_8 = arith.constant dense<0.000000e+00> : vector<4xf32>
    %9 = vector.multi_reduction <add>, %8, %cst_8 [1] : vector<4x256xf32> to vector<4xf32>
    %10 = vector.shape_cast %9 : vector<4xf32> to vector<4x1xf32>
    %11 = arith.mulf %8, %8 : vector<4x256xf32>
    %cst_9 = arith.constant dense<0.000000e+00> : vector<4xf32>
    %12 = vector.multi_reduction <add>, %11, %cst_9 [1] : vector<4x256xf32> to vector<4xf32>
    %13 = vector.shape_cast %12 : vector<4xf32> to vector<4x1xf32>
    %cst_10 = arith.constant 3.906250e-03 : f32
    %14 = vector.broadcast %cst_10 : f32 to vector<4x1xf32>
    %15 = arith.mulf %10, %14 : vector<4x1xf32>
    %cst_11 = arith.constant 3.906250e-03 : f32
    %16 = vector.broadcast %cst_11 : f32 to vector<4x1xf32>
    %17 = arith.mulf %13, %16 : vector<4x1xf32>
    %18 = arith.mulf %15, %15 : vector<4x1xf32>
    %19 = arith.subf %17, %18 : vector<4x1xf32>
    %cst_12 = arith.constant 0.000000e+00 : f32
    %20 = vector.broadcast %cst_12 : f32 to vector<4x1xf32>
    %21 = arith.maximumf %19, %20 : vector<4x1xf32>
    %cst_13 = arith.constant 9.99999974E-6 : f32
    %22 = vector.broadcast %cst_13 : f32 to vector<4x1xf32>
    %23 = arith.addf %21, %22 : vector<4x1xf32>
    %24 = math.rsqrt %23 : vector<4x1xf32>
    %25 = vector.broadcast %24 : vector<4x1xf32> to vector<4x256xf32>
    %26 = arith.mulf %5, %25 : vector<4x256xf32>
    %27 = vector.broadcast %24 : vector<4x1xf32> to vector<4x256xf32>
    %28 = arith.addf %26, %27 : vector<4x256xf32>
    %29 = vector.broadcast %15 : vector<4x1xf32> to vector<4x256xf32>
    %30 = arith.mulf %29, %28 : vector<4x256xf32>
    %31 = arith.subf %6, %30 : vector<4x256xf32>
    %32 = arith.mulf %8, %28 : vector<4x256xf32>
    %33 = arith.addf %32, %31 : vector<4x256xf32>
    %c0_14 = arith.constant 0 : index
    %c0_15 = arith.constant 0 : index
    %c0_16 = arith.constant 0 : index
    %34 = vector.load %arg5[%c0_14, %c0_15, %c0_16] : memref<1x4x256xf32, #tpu.memory_space<vmem>>, vector<1x4x256xf32>
    %35 = vector.shape_cast %34 : vector<1x4x256xf32> to vector<4x256xf32>
    %36 = vector.shape_cast %33 : vector<4x256xf32> to vector<1x4x256xf32>
    tpu.vector_store %arg5[%c0_14, %c0_15, %c0_16], %36 {strides = array<i32>} : memref<1x4x256xf32, #tpu.memory_space<vmem>>, vector<1x4x256xf32>,
    return
  }
  func.func @transform_0(%arg0: i32, %arg1: i32) -> (i32, i32, i32) {
    %c0_i32 = arith.constant 0 : i32
    %c0_i32_0 = arith.constant 0 : i32
    return %arg0, %arg1, %c0_i32 : i32, i32, i32
  }
  func.func @transform_1(%arg0: i32, %arg1: i32) -> (i32, i32, i32) {
    %c0_i32 = arith.constant 0 : i32
    %c0_i32_0 = arith.constant 0 : i32
    %c0_i32_1 = arith.constant 0 : i32
    return %arg0, %c0_i32, %c0_i32_0 : i32, i32, i32
  }
  func.func @transform_2(%arg0: i32, %arg1: i32) -> (i32, i32, i32) {
    %c0_i32 = arith.constant 0 : i32
    %c0_i32_0 = arith.constant 0 : i32
    return %arg0, %arg1, %c0_i32 : i32, i32, i32
  }
  func.func @transform_3(%arg0: i32, %arg1: i32) -> (i32, i32, i32) {
    %c0_i32 = arith.constant 0 : i32
    %c0_i32_0 = arith.constant 0 : i32
    return %arg0, %arg1, %c0_i32 : i32, i32, i32
  }
}

</mosaic_0001>

<bundles_post_ra>
// kernel: tpu_custom_call.1
= control target key start
LH: loop header
LB: loop body
LE: loop exit
PB: predicated region body
PF: predicated region fallthrough
CT: control target
= control target key end

     0   :  { %s1043_s0 = inlined_call_operand.hbm [shape: f32[2,8,8], index: 0, kind: input, shape index: {}]   ;;  %s1044_s1 = inlined_call_operand.hbm [shape: f32[2,8,256], index: 1, kind: input, shape index: {}]   ;;  %s1045_s2 = inlined_call_operand.hbm [shape: f32[2,4,256], index: 2, kind: input, shape index: {}]   ;;  %s1046_s3 = inlined_call_operand.hbm [shape: f32[2,4,256], index: 3, kind: output, shape index: {}]  }
   0x1   :  { %1049 = sst [smem:[#allocation14_spill]] %s1044_s1 }
   0x2   :  { %8 = vsyncpa [#allocation3], 0 }
   0x3   :  { %10 = vsyncpa [#allocation3 + $0x1], 0 }
   0x4   :  { %11 = vsyncpa [#allocation6], 0 }
   0x5   :  { %13 = vsyncpa [#allocation6 + $0x1], 0 }
   0x6   :  { %14 = vsyncpa [#allocation4], 0 }
   0x7   :  { %16 = vsyncpa [#allocation4 + $0x1], 0  ;;  %s851_s12 = smov 0   ;;  %s853_s13 = smov 0  }
   0x8   :  { %s855_s14 = smov 0   ;;  %s857_s15 = smov 0  }
   0x9   :  { %s859_s16 = smov 0   ;;  %s861_s17 = smov 0  }
   0xa LB: > { %1050 = sst [smem:[#allocation12_spill]] %s820_s16  ;;  %s882_s18 = sadd.s32 4294967295, %s824_s17   ;;  %s824_s17 = sphi %s861_s17, %s22_s17   ;;  %s820_s16 = sphi %s859_s16, %s1061_s16   ;;  %s816_s15 = sphi %s857_s15, %s1060_s15   ;;  %s812_s14 = sphi %s855_s14, %s1064_s14   ;;  %s808_s13 = sphi %s853_s13, %s1063_s13   ;;  %s804_s12 = sphi %s851_s12, %s1062_s12  }
   0xb   : > { %s555_s19 = sadd.s32 4294967294, %s824_s17   ;;  %s34_s20 = sadd.s32 1, %s820_s16 }
   0xc   : > { %s43_s21 = sadd.s32 1, %s812_s14  ;;  %p36_p0 = scmp.ge.s32.totalorder %s34_s20, 2 }
   0xd   : > { %p50_p1 = scmp.ne.s32.totalorder %s812_s14, %s808_s13  ;;  %p51_p2 = scmp.eq.s32.totalorder %s824_s17, 0 }
   0xe   : > { %p56_p3 = scmp.ne.s32.totalorder %s808_s13, %s804_s12  ;;  %s1066_s20 = smov (%p36_p0, %s34_s20), 0 }
   0xf   : > { %1051 = sst [smem:[#allocation13_spill]] %s1066_s20  ;;  %p894_p4 = por %p51_p2, %p50_p1 }
  0x10   : > { %p57_p5 = scmp.eq.s32.totalorder %s882_s18, 0  ;;  %s38_s23 = ssub.s32 %s820_s16, %s1066_s20 }
  0x11   : > { %p136_p6 = scmp.eq.s32.totalorder %s882_s18, 1  ;;  %p41_p7 = scmp.eq.s32.totalorder %s38_s23, 0 }
  0x12   : > { %p902_p8 = por %p57_p5, %p56_p3  ;;  %p142_p10 = scmp.eq.s32.totalorder %s555_s19, 1 }
  0x13   : > { %p906_p9 = por %p136_p6, %p50_p1  ;;  %p602_p13 = scmp.lt.s32.totalorder %s824_s17, 2 }
  0x14   : > { %s911_s26 = scalar_select %p41_p7, %s812_s14, %s43_s21  }
  0x15   : > { %p913_p11 = por %p142_p10, %p56_p3  ;;  %s920_s28 = sand.u32 1, %s812_s14  }
  0x16   : > { %s181_s29 = sand.u32 1, %s824_s17   ;;  %s560_s30 = sshll.u32 %s920_s28, 4 }
  0x17   : > { %p926_p0 = pnand %p602_p13, %p894_p4  ;;  %s577_s5 = sshll.u32 %s820_s16, 8 }
  0x18   : > { %s1057_s1 = sld [smem:[#allocation14_spill]]  ;;  %s185_s9 = scalar_lea.vmem [#allocation5], %s560_s30 }
  0x19   : > { %s193_s10 = sshll.u32 %s185_s9, 4  ;;  %p566_p1 = scmp.ge.s32.totalorder %s824_s17, 1  ;;  %s194_s10 = int_to_ptr.vmem [resolvable:$true] %s193_s10 }
  0x1a   : > { %p219_p2 = scmp.lt.s32.totalorder %s824_s17, 3  ;;  %s936_s11 = scalar_lea.sflag [#allocation6], %s181_s29 }
  0x1b   : > { %p658_p3 = pneg %p926_p0  ;;  %s669_s19 = scalar_lea.vmem %s194_s10, 256 }
  0x1c   : > { %p670_p4 = scmp.ne.s32.totalorder %s194_s10, %s669_s19  ;;  %s826_s21 = smov [#allocation5]  }
  0x1d   : > { %s674_s22 = sshll.u32 %s826_s21, 4  ;;  %s675_s22 = int_to_ptr.vmem [resolvable:$false] %s674_s22 }
  0x1e   : > { %s191_s8 = scalar_lea.hbm %s1057_s1, %s577_s5  ;;  %p672_p5 = pnand %p670_p4, %p658_p3 }
  0x1f   : > { %s676_s23 = scalar_lea.vmem %s675_s22, 512  ;;  %p677_p7 = scmp.lt.s32.totalorder %s194_s10, %s675_s22 }
  0x20   : > { %p673_p6 = pneg %p672_p5  ;;  %p678_p10 = scmp.lt.s32.totalorder %s676_s23, %s669_s19 }
  0x22   : > { %p679_p13 = por %p678_p10, %p677_p7 }
  0x24   : > { %p680_p12 = pnand %p679_p13, %p673_p6 }
  0x26   : > { %683 = shalt.err (!%p680_p12)
}
  0x27   : > { %594 = dma.hbm_to_vmem [thread:$0]  (!%p926_p0), %s191_s8, 256, %s194_s10, %s936_s11  }
  0x28   : > { %p950_p4 = pnand %p566_p1, %p219_p2  ;;  %s558_s30 = sshll.u32 %s920_s28, 3 }
  0x29   : > { %s559_s5 = sshll.u32 %s820_s16, 7  ;;  %s166_s19 = scalar_lea.vmem [#allocation2], %s558_s30 }
  0x2a   : > { %s172_s9 = scalar_lea.hbm %s1043_s0, %s559_s5  ;;  %s174_s21 = sshll.u32 %s166_s19, 4  ;;  %s175_s21 = int_to_ptr.vmem [resolvable:$true] %s174_s21 }
  0x2b   : > { %s962_s1 = scalar_lea.hbm %s1045_s2, %s559_s5  ;;  %s163_s8 = scalar_lea.sflag [#allocation3], %s920_s28 }
  0x2c   : > { %s697_s10 = scalar_lea.vmem %s175_s21, 128  ;;  %s827_s20 = smov [#allocation2]  }
  0x2d   : > { %p698_p12 = scmp.ne.s32.totalorder %s175_s21, %s697_s10  ;;  %s702_s16 = sshll.u32 %s827_s20, 4  ;;  %s703_s16 = int_to_ptr.vmem [resolvable:$false] %s702_s16 }
  0x2e   : > { %s704_s6 = scalar_lea.vmem %s703_s16, 256  ;;  %p705_p5 = scmp.lt.s32.totalorder %s175_s21, %s703_s16 }
  0x2f   : > { %p700_p1 = pnand %p698_p12, %p658_p3  ;;  %p706_p6 = scmp.lt.s32.totalorder %s704_s6, %s697_s10 }
  0x31   : > { %p701_p2 = pneg %p700_p1  ;;  %p707_p7 = por %p706_p6, %p705_p5 }
  0x33   : > { %p708_p10 = pnand %p707_p7, %p701_p2 }
  0x35   : > { %711 = shalt.err (!%p708_p10)
}
  0x36   : > { %591 = dma.hbm_to_vmem [thread:$0]  (!%p926_p0), %s172_s9, 128, %s175_s21, %s163_s8  }
  0x37   : > { %s204_s28 = scalar_lea.vmem [#allocation7], %s558_s30  ;;  %s828_s20 = smov [#allocation7]  }
  0x38   : > { %s214_s5 = sshll.u32 %s204_s28, 4  ;;  %s730_s19 = sshll.u32 %s828_s20, 4  ;;  %s215_s5 = int_to_ptr.vmem [resolvable:$true] %s214_s5  ;;  %s731_s19 = int_to_ptr.vmem [resolvable:$false] %s730_s19 }
  0x39   : > { %s725_s7 = scalar_lea.vmem %s215_s5, 128  ;;  %s732_s16 = scalar_lea.vmem %s731_s19, 256 }
  0x3a   : > { %p726_p13 = scmp.ne.s32.totalorder %s215_s5, %s725_s7  ;;  %p733_p5 = scmp.lt.s32.totalorder %s215_s5, %s731_s19 }
  0x3b   : > { %p734_p2 = scmp.lt.s32.totalorder %s732_s16, %s725_s7 }
  0x3c   : > { %p728_p12 = pnand %p726_p13, %p658_p3 }
  0x3d   : > { %p735_p6 = por %p734_p2, %p733_p5 }
  0x3e   : > { %p729_p1 = pneg %p728_p12 }
  0x40   : > { %p736_p7 = pnand %p735_p6, %p729_p1 }
  0x42   : > { %739 = shalt.err (!%p736_p7)
}
  0x43   : > { %597 = dma.hbm_to_vmem [thread:$0]  (!%p926_p0), %s962_s1, 128, %s215_s5, %s936_s11  }
  0x44   : > { %223 = sbr.rel (%p950_p4) target bundleno = 302 (0x12e), region = 32  ;;  %s980_s30 = sand.u32 (!%p950_p4), 1, %s808_s13  }
  0x45   : > { %s983_s9 = sshll.u32 (!%p950_p4), %s980_s30, 3  ;;  %s226_s21 = scalar_lea.sflag (!%p950_p4), [#allocation3], %s980_s30 }
  0x46   : > { %s229_s22 = scalar_lea.vmem (!%p950_p4), [#allocation2], %s983_s9 }
  0x49   : > { %791 = dma.done.wait (%p902_p8), %s226_s21, 128  }
  0x4a   : > { %793 = vsyncadd (%p902_p8), %s226_s21, 4294967168  ;;  %s234_s1 = sand.u32 1, %s882_s18   ;;  %s568_s4 = sshll.u32 %s980_s30, 4 }
  0x4b   : > { %s235_s11 = scalar_lea.sflag [#allocation6], %s234_s1  ;;  %s238_s29 = scalar_lea.vmem [#allocation5], %s568_s4 }
  0x4c   : > { %795 = dma.done.wait (%p902_p8), %s235_s11, 384  }
  0x4d   : > { %797 = vsyncadd (%p902_p8), %s235_s11, 4294966912  ;;  %v829_v0 = vmov 0.0   ;;  %vm362_vm0 = vcmask 1043456   ;;  %v282_v1 = vld [vmem:[%s238_s29 + $0x8] sm:$0xff]  ;;  %v281_v2 = vld [vmem:[%s238_s29] sm:$0xff]  ;;  %vm283_vm1 = vcmask 64512  }
  0x4e   : > { %351 = vmatprep.mubr.f32.mxu0 %v829_v0  ;;  %v280_v3 = vld [vmem:[%s229_s22] sm:$0xff]  ;;  %317 = vmatprep.subr.mxu0 %v282_v1  ;;  %s247_s23 = scalar_lea.vmem [#allocation7], %s983_s9  ;;  %s579_s18 = sshll.u32 %s816_s15, 7 }
  0x4f   : > { %v358_v4 = vld [vmem:[%s247_s23] sm:$0xff]  ;;  %318 = vmatpush1.msra.mxu0 %v281_v2  ;;  %s279_s24 = scalar_lea.vmem [#allocation8], %s983_s9  ;;  %s424_s28 = scalar_lea.hbm %s1046_s3, %s579_s18 }
  0x50   : > { %v360_v5 = vcombine.high %v358_v4, %v358_v4  ;;  %v363_v6 = vsel %vm362_vm0, %v358_v4, 0.0  ;;  %v368_v7 = vmul.f32 %v358_v4, %v358_v4  ;;  %571 = vmatmul.mubr.msk.f32.vlgmr.msra.gmra.mxu0 %vm283_vm1, %v280_v3  ;;  %s426_s8 = sshll.u32 %s279_s24, 4  ;;  %s410_s5 = scalar_lea.sflag [#allocation4], %s980_s30  ;;  %s427_s8 = int_to_ptr.vmem [resolvable:$true] %s426_s8 }
  0x51   : > { %s740_s7 = scalar_lea.vmem %s427_s8, 128  ;;  %s830_s20 = smov [#allocation8]  }
  0x52   : > { %v364_v8 = vsel %vm362_vm0, %v360_v5, 0.0  ;;  %v370_v9 = vcombine.high %v368_v7, %v368_v7  ;;  %v372_v10 = vsel %vm362_vm0, %v368_v7, 0.0  ;;  %p741_p8 = scmp.ne.s32.totalorder %s427_s8, %s740_s7  ;;  %s744_s19 = sshll.u32 %s830_s20, 4  ;;  %s745_s19 = int_to_ptr.vmem [resolvable:$false] %s744_s19 }
  0x53   : > { %v365_v11 = vadd.f32 %v364_v8, %v363_v6  ;;  %s746_s15 = scalar_lea.vmem %s745_s19, 256  ;;  %p747_p4 = scmp.lt.s32.totalorder %s427_s8, %s745_s19 }
  0x54   : > { %v373_v12 = vsel %vm362_vm0, %v370_v9, 0.0  ;;  %p742_p0 = pnand %p741_p8, %p906_p9  ;;  %p748_p10 = scmp.lt.s32.totalorder %s746_s15, %s740_s7 }
  0x55   : > { %366 = vadd.xlane.f32.xlu0 %v365_v11  ;;  %v374_v13 = vadd.f32 %v373_v12, %v372_v10 }
  0x56   : > { %p743_p3 = pneg %p742_p0  ;;  %p749_p13 = por %p748_p10, %p747_p4 }
  0x58   : > { %p750_p12 = pnand %p749_p13, %p743_p3 }
  0x59   : > { %375 = vadd.xlane.f32.xlu0 %v374_v13 }
  0xde   : > { %v367_v14 = vpop.xlane.xlu0 %366 }
  0xdf   : > { %v377_v15 = vmul.f32 0.00390625, %v367_v14 }
  0xe1   : > { %v379_v17 = vmul.f32 %v377_v15, %v377_v15 }
  0xe2   : > { %v376_v16 = vpop.xlane.xlu0 %375 }
  0xe3   : > { %v378_v18 = vmul.f32 0.00390625, %v376_v16 }
  0xe5   : > { %v380_v19 = vsub.f32 %v378_v18, %v379_v17 }
  0xe7   : > { %v381_v20 = vmax.f32 %v380_v19, 0.0 }
  0xe9   : > { %v382_v21 = vadd.f32 1e-05, %v381_v20 }
  0xeb   : > { %654 = vrsqrt.f32 %v382_v21 }
  0xf8   : > { %v655_v22 = vpop.eup %654 }
 0x110   : > { %v353_v23 = vpop.f32.mrf.mxu0 }
 0x111   : > { %v384_v24 = vmul.f32 %v655_v22, %v353_v23 }
 0x112   : > { %v355_v25 = vpop.f32.mrf.mxu0 }
 0x113   : > { %v386_v26 = vadd.f32 %v655_v22, %v384_v24  ;;  %v385_v27 = vmul.f32 %v655_v22, %v355_v25 }
 0x115   : > { %v388_v28 = vmul.f32 %v386_v26, %v377_v15  ;;  %v387_v29 = vadd.f32 %v655_v22, %v385_v27 }
 0x117   : > { %v392_v30 = vrot.slane %v388_v28, 4  ;;  %v389_v31 = vmul.f32 %v387_v29, %v377_v15  ;;  %v400_v33 = vcombine.low %v386_v26, %v387_v29 }
 0x119   : > { %v393_v32 = vrot.slane %v389_v31, 4  ;;  %v396_v34 = vsub.f32 %v353_v23, %v392_v30  ;;  %v402_v36 = vmul.f32 %v400_v33, %v358_v4 }
 0x11b   : > { %v397_v35 = vsub.f32 %v355_v25, %v393_v32 }
 0x11d   : > { %v405_v37 = vcombine.high %v396_v34, %v397_v35 }
 0x11f   : > { %v407_v38 = vadd.f32 %v405_v37, %v402_v36 }
 0x121   : > { %408 = vst [vmem:[%s279_s24] sm:$0xff] %v407_v38 }
 0x122   : > { %753 = shalt.err (!%p750_p12)
}
 0x123   : > { %s754_s16 = scalar_lea.hbm %s424_s28, 128  ;;  %s758_s21 = scalar_lea.hbm %s1046_s3, 256 }
 0x124   : > { %p755_p1 = scmp.ne.s32.totalorder %s424_s28, %s754_s16  ;;  %p759_p6 = scmp.lt.s32.totalorder %s424_s28, %s1046_s3 }
 0x125   : > { %p760_p7 = scmp.lt.s32.totalorder %s758_s21, %s754_s16 }
 0x126   : > { %p756_p5 = pnand %p755_p1, %p906_p9 }
 0x127   : > { %p761_p8 = por %p760_p7, %p759_p6 }
 0x128   : > { %p757_p2 = pneg %p756_p5 }
 0x12a   : > { %p762_p0 = pnand %p761_p8, %p757_p2 }
 0x12c   : > { %765 = shalt.err (!%p762_p0)
}
 0x12d   : > { %586 = dma.vmem_to_hbm [thread:$0]  (%p906_p9), %s427_s8, 128, %s424_s28, %s410_s5  }
 0x12e PF: > { %s438_s4 = sand.u32 1, %s804_s12   ;;  %p1059_p3 = scmp.ge.s32.totalorder %s824_s17, 2 }
 0x12f   : > { %s439_s11 = scalar_lea.sflag [#allocation4], %s438_s4 }
 0x130   : > { %p599_p4 = pnand %p1059_p3, %p913_p11 }
 0x132   : > { %p600_p10 = pneg %p599_p4 }
 0x134   : > { %799 = dma.done.wait (%p600_p10), %s439_s11, 128  }
 0x135   : > { %801 = vsyncadd (%p600_p10), %s439_s11, 4294967168  ;;  %s22_s17 = sadd.s32 1, %s824_s17   ;;  %s1060_s15 = sld [smem:[#allocation12_spill]] }
 0x136   : > { %p19_p13 = scmp.ge.s32.totalorder %s22_s17, 4   ;;  %s1061_s16 = sld [smem:[#allocation13_spill]] }
 0x137   : > { %s1062_s12 = smov %s808_s13  ;;  %s1063_s13 = smov %s812_s14 }
 0x138   : > { %s1064_s14 = smov %s911_s26  ;;  %21 = sbr.rel (!%p19_p13) target bundleno = 10 (0xa), region = 101 }
 0x13d   :  { %444 = vsyncpa [#allocation3], 1 }
 0x13e   :  { %446 = vsyncpa [#allocation3 + $0x1], 1 }
 0x13f   :  { %447 = vsyncpa [#allocation6], 1 }
 0x140   :  { %449 = vsyncpa [#allocation6 + $0x1], 1 }
 0x141   :  { %450 = vsyncpa [#allocation4], 1 }
 0x142   :  { %452 = vsyncpa [#allocation4 + $0x1], 1 }

</bundles_post_ra>
